<compile_context>
chip_gen: v7x
topology: tpu7x:2x2x1
jax: 0.10.0
libtpu: 0.0.40
codegen_flags: <defaults>
</compile_context>

<pallas_src>
import jax
import jax.numpy as jnp
from jax import lax
from jax.experimental import pallas as pl
from jax.experimental.pallas import tpu as pltpu

_OUT_PAD = 128       # lane-dense output width (true logits live in [:, :2])
_TB_MAX = 4096       # max batch-tile rows per grid step (multiple of 8)
_TB_SPLIT_MIN = 256  # batch size at/above which we force >= 2 grid steps (v7x)


def binary_net1_kernel(x_ref, w1_ref, b1_ref, w2_ref, b2_ref, o_ref):
    x = x_ref[...]  # f32 tile (TB, feat)

    # F.normalize(x, p=2, dim=1, eps=1e-12):
    #   x / max(||x||, 1e-12)  ==  x * rsqrt(max(||x||^2, 1e-24))
    # Keep the sum-of-squares / rsqrt in f32 (correctness; v5e has no bf16 EUP).
    sq = jnp.sum(x * x, axis=1, keepdims=True)            # (TB, 1)
    inv_norm = lax.rsqrt(jnp.maximum(sq, 1e-24))           # (TB, 1)

    # fc_layer1 with BatchNorm1d (eval) and b1 pre-folded into w1/b1 on host.
    # The per-row norm scale commutes with the matmul, so apply it to the
    # (TB, hidden) product instead of the (TB, feat) input (4x fewer VPU muls).
    # TODO(synk): cast x/W1/W2 to bf16 here (preferred_element_type=f32) only
    # if the producer can hand x to the kernel already in bf16 — a standalone
    # wrapper-side cast costs more HBM bandwidth than the MXU gain is worth.
    h = jnp.dot(x, w1_ref[...], preferred_element_type=jnp.float32)
    h = h * inv_norm + b1_ref[...]

    # ReLU
    h = jnp.maximum(h, 0.0)

    # TODO(synk): nn.Dropout is identity in eval mode; training-mode dropout
    # (pltpu.prng_random_bits mask) intentionally not applied here.

    # fc_layer2: W2/b2 zero-padded to 128 lanes -> single clean MXU matmul.
    out = jnp.dot(h, w2_ref[...], preferred_element_type=jnp.float32) + b2_ref[...]

    # Lane-dense bf16 store (f32 accumulation above; logits don't need f32).
    o_ref[...] = out.astype(o_ref.dtype)


def _choose_tiling(B):
    """Pick (tb, b_pad) with tb | b_pad, preferring b_pad == B (no jnp.pad),
    tb a multiple of 8 (or the full batch), and >= 2 grid steps for large B so
    the 'parallel' batch axis can feed both v7x TensorCores."""
    if B <= _TB_MAX:
        if B >= _TB_SPLIT_MIN and B % 16 == 0:
            return B // 2, B              # >= 2 grid steps, still no padding
        return B, B                       # single full-array block, no padding
    if B % 8 == 0:
        tb = (_TB_MAX // 8) * 8
        while tb >= 8:                    # largest multiple-of-8 divisor of B
            if B % tb == 0:
                return tb, B              # divisor tile, no padding
            tb -= 8
    # Last resort (ragged large B): pad once. This is an extra HBM copy of x
    # outside the kernel; avoided whenever B admits a clean tile above.
    return _TB_MAX, pl.cdiv(B, _TB_MAX) * _TB_MAX


def binary_net1_forward(x, w1, b1, bn_gamma, bn_beta, bn_mean, bn_var, w2, b2,
                        *, bn_eps=1e-5):
    """Folds BN + b1 into W1/bias, pads W2/b2 to 128 lanes, runs the kernel.

    Returns bfloat16 logits of shape (B, 2).
    """
    B, feat_dim = x.shape
    hidden = w1.shape[1]
    out_dim = w2.shape[1]
    assert w1.shape == (feat_dim, hidden)
    assert w2.shape == (hidden, out_dim)

    x = x.astype(jnp.float32)

    # --- host-side folds (done once in XLA, outside the kernel hot path) ---
    scale = bn_gamma / jnp.sqrt(bn_var + bn_eps)           # (hidden,)
    w1_f = (w1 * scale[None, :]).astype(jnp.float32)        # (feat, hidden)
    b1_f = (b1 * scale + bn_beta - bn_mean * scale).reshape(1, hidden)
    b1_f = b1_f.astype(jnp.float32)

    w2_p = jnp.zeros((hidden, _OUT_PAD), jnp.float32).at[:, :out_dim].set(w2)
    b2_p = jnp.zeros((1, _OUT_PAD), jnp.float32).at[0, :out_dim].set(b2)

    # --- batch tiling (no wrapper-side pad unless B is ragged and huge) ---
    tb, b_pad = _choose_tiling(B)
    x_p = x if b_pad == B else jnp.pad(x, ((0, b_pad - B), (0, 0)))
    grid = (b_pad // tb,)

    # NOTE: resident weights could be single-buffered (pipeline_mode) and x/out
    # swept at Buffered(3); both are minor for this mem-bound kernel, so the
    # default double-buffering is kept.
    out = pl.pallas_call(
        binary_net1_kernel,
        out_shape=jax.ShapeDtypeStruct((b_pad, _OUT_PAD), jnp.bfloat16),
        grid=grid,
        in_specs=[
            pl.BlockSpec((tb, feat_dim), lambda i: (i, 0)),        # x tile
            pl.BlockSpec((feat_dim, hidden), lambda i: (0, 0)),    # W1 (resident)
            pl.BlockSpec((1, hidden), lambda i: (0, 0)),           # b1 (resident)
            pl.BlockSpec((hidden, _OUT_PAD), lambda i: (0, 0)),    # W2 (resident)
            pl.BlockSpec((1, _OUT_PAD), lambda i: (0, 0)),         # b2 (resident)
        ],
        out_specs=pl.BlockSpec((tb, _OUT_PAD), lambda i: (i, 0)),
        compiler_params=pltpu.CompilerParams(
            dimension_semantics=("parallel",)),
    )(x_p, w1_f, b1_f, w2_p, b2_p)

    # Free wrapper-side slice back to the true logit shape.
    return out[:B, :out_dim]


def _torch_linear_init(key, in_dim, out_dim):
    """Deterministic nn.Linear-style init: U(-1/sqrt(in), 1/sqrt(in))."""
    kw, kb = jax.random.split(key)
    bound = 1.0 / jnp.sqrt(jnp.float32(in_dim))
    # Stored as (in_dim, out_dim) == PyTorch weight.T
    w = jax.random.uniform(kw, (in_dim, out_dim), jnp.float32, -bound, bound)
    b = jax.random.uniform(kb, (out_dim,), jnp.float32, -bound, bound)
    return w, b


if __name__ == "__main__":
    key = jax.random.PRNGKey(0)
    k_x, k_fc1, k_fc2 = jax.random.split(key, 3)

    # Small shapes consistent with the module: batch=8, feat_dim=128, hidden=32.
    B, feat_dim, hidden = 8, 128, 32

    x = jax.random.normal(k_x, (B, feat_dim), jnp.float32)

    w1, b1 = _torch_linear_init(k_fc1, feat_dim, hidden)
    w2, b2 = _torch_linear_init(k_fc2, hidden, 2)

    # BatchNorm1d default init / running stats (eval mode)
    bn_gamma = jnp.ones((hidden,), jnp.float32)
    bn_beta = jnp.zeros((hidden,), jnp.float32)
    bn_mean = jnp.zeros((hidden,), jnp.float32)
    bn_var = jnp.ones((hidden,), jnp.float32)

    out = binary_net1_forward(x, w1, b1, bn_gamma, bn_beta, bn_mean, bn_var, w2, b2)
    out = jax.block_until_ready(out)

    # Pure-JAX reference of the same semantics (f32).
    xn = x / jnp.maximum(jnp.linalg.norm(x, axis=1, keepdims=True), 1e-12)
    h = xn @ w1 + b1
    h = (h - bn_mean) / jnp.sqrt(bn_var + 1e-5) * bn_gamma + bn_beta
    h = jnp.maximum(h, 0.0)
    ref = h @ w2 + b2

    assert out.shape == (B, 2)
    assert out.dtype == jnp.bfloat16
    # bf16 writeback => compare at bf16 precision (~2^-8 relative).
    assert jnp.allclose(out.astype(jnp.float32), ref, atol=1e-2, rtol=1e-2), \
        "mismatch vs reference"

    print("KERNEL_OK")
</pallas_src>

<mosaic_0001>
module attributes {stable_mosaic.version = 11 : i64} {
  func.func @binary_net1_kernel(%arg0: i32, %arg1: memref<8x128xf32, #tpu.memory_space<vmem>>, %arg2: memref<128x32xf32, #tpu.memory_space<vmem>>, %arg3: memref<1x32xf32, #tpu.memory_space<vmem>>, %arg4: memref<32x128xf32, #tpu.memory_space<vmem>>, %arg5: memref<1x128xf32, #tpu.memory_space<vmem>>, %arg6: memref<8x128xbf16, #tpu.memory_space<vmem>>) attributes {dimension_semantics = [#tpu.dimension_semantics<parallel>], iteration_bounds = array<i64: 1>, scalar_prefetch = 0 : i64, scratch_operands = 0 : i64, tpu.core_type = #tpu.core_type<tc>, window_params = [{transform_indices = @transform_0, window_bounds = array<i64: 8, 128>}, {pipeline_mode = #tpu.pipeline_mode<synchronous>, transform_indices = @transform_1, window_bounds = array<i64: 128, 32>}, {pipeline_mode = #tpu.pipeline_mode<synchronous>, transform_indices = @transform_2, window_bounds = array<i64: 1, 32>}, {pipeline_mode = #tpu.pipeline_mode<synchronous>, transform_indices = @transform_3, window_bounds = array<i64: 32, 128>}, {pipeline_mode = #tpu.pipeline_mode<synchronous>, transform_indices = @transform_4, window_bounds = array<i64: 1, 128>}, {transform_indices = @transform_5, window_bounds = array<i64: 8, 128>}]} {
    %c0 = arith.constant 0 : index
    %c0_0 = arith.constant 0 : index
    %0 = vector.load %arg1[%c0, %c0_0] : memref<8x128xf32, #tpu.memory_space<vmem>>, vector<8x128xf32>
    %1 = arith.mulf %0, %0 : vector<8x128xf32>
    %cst = arith.constant dense<0.000000e+00> : vector<8xf32>
    %2 = vector.multi_reduction <add>, %1, %cst [1] : vector<8x128xf32> to vector<8xf32>
    %3 = vector.shape_cast %2 : vector<8xf32> to vector<8x1xf32>
    %cst_1 = arith.constant 1.000000e-24 : f32
    %4 = vector.broadcast %cst_1 : f32 to vector<8x1xf32>
    %5 = arith.maximumf %3, %4 : vector<8x1xf32>
    %6 = math.rsqrt %5 : vector<8x1xf32>
    %c0_2 = arith.constant 0 : index
    %c0_3 = arith.constant 0 : index
    %7 = vector.load %arg2[%c0_2, %c0_3] : memref<128x32xf32, #tpu.memory_space<vmem>>, vector<128x32xf32>
    %cst_4 = arith.constant dense<0.000000e+00> : vector<8x32xf32>
    %8 = tpu.matmul %0, %7, %cst_4 {dimension_numbers = #tpu.dot_dimension_numbers<[1], [0], [0], [1], [0, 0, 1, 1], [], []>} : vector<8x128xf32>, vector<128x32xf32>, vector<8x32xf32> -> vector<8x32xf32>
    %9 = vector.broadcast %6 : vector<8x1xf32> to vector<8x32xf32>
    %10 = arith.mulf %8, %9 : vector<8x32xf32>
    %c0_5 = arith.constant 0 : index
    %c0_6 = arith.constant 0 : index
    %11 = vector.load %arg3[%c0_5, %c0_6] : memref<1x32xf32, #tpu.memory_space<vmem>>, vector<1x32xf32>
    %12 = vector.broadcast %11 : vector<1x32xf32> to vector<8x32xf32>
    %13 = arith.addf %10, %12 : vector<8x32xf32>
    %cst_7 = arith.constant 0.000000e+00 : f32
    %14 = vector.broadcast %cst_7 : f32 to vector<8x32xf32>
    %15 = arith.maximumf %13, %14 : vector<8x32xf32>
    %c0_8 = arith.constant 0 : index
    %c0_9 = arith.constant 0 : index
    %16 = vector.load %arg4[%c0_8, %c0_9] : memref<32x128xf32, #tpu.memory_space<vmem>>, vector<32x128xf32>
    %cst_10 = arith.constant dense<0.000000e+00> : vector<8x128xf32>
    %17 = tpu.matmul %15, %16, %cst_10 {dimension_numbers = #tpu.dot_dimension_numbers<[1], [0], [0], [1], [0, 0, 1, 1], [], []>} : vector<8x32xf32>, vector<32x128xf32>, vector<8x128xf32> -> vector<8x128xf32>
    %c0_11 = arith.constant 0 : index
    %c0_12 = arith.constant 0 : index
    %18 = vector.load %arg5[%c0_11, %c0_12] : memref<1x128xf32, #tpu.memory_space<vmem>>, vector<1x128xf32>
    %19 = vector.broadcast %18 : vector<1x128xf32> to vector<8x128xf32>
    %20 = arith.addf %17, %19 : vector<8x128xf32>
    %21 = arith.truncf %20 : vector<8x128xf32> to vector<8x128xbf16>
    %c0_13 = arith.constant 0 : index
    %c0_14 = arith.constant 0 : index
    %22 = vector.load %arg6[%c0_13, %c0_14] : memref<8x128xbf16, #tpu.memory_space<vmem>>, vector<8x128xbf16>
    tpu.vector_store %arg6[%c0_13, %c0_14], %21 {strides = array<i32>} : memref<8x128xbf16, #tpu.memory_space<vmem>>, vector<8x128xbf16>,
    return
  }
  func.func @transform_0(%arg0: i32) -> (i32, i32) {
    %c0_i32 = arith.constant 0 : i32
    %c0_i32_0 = arith.constant 0 : i32
    return %arg0, %c0_i32 : i32, i32
  }
  func.func @transform_1(%arg0: i32) -> (i32, i32) {
    %c0_i32 = arith.constant 0 : i32
    %c0_i32_0 = arith.constant 0 : i32
    %c0_i32_1 = arith.constant 0 : i32
    return %c0_i32, %c0_i32_0 : i32, i32
  }
  func.func @transform_2(%arg0: i32) -> (i32, i32) {
    %c0_i32 = arith.constant 0 : i32
    %c0_i32_0 = arith.constant 0 : i32
    %c0_i32_1 = arith.constant 0 : i32
    return %c0_i32, %c0_i32_0 : i32, i32
  }
  func.func @transform_3(%arg0: i32) -> (i32, i32) {
    %c0_i32 = arith.constant 0 : i32
    %c0_i32_0 = arith.constant 0 : i32
    %c0_i32_1 = arith.constant 0 : i32
    return %c0_i32, %c0_i32_0 : i32, i32
  }
  func.func @transform_4(%arg0: i32) -> (i32, i32) {
    %c0_i32 = arith.constant 0 : i32
    %c0_i32_0 = arith.constant 0 : i32
    %c0_i32_1 = arith.constant 0 : i32
    return %c0_i32, %c0_i32_0 : i32, i32
  }
  func.func @transform_5(%arg0: i32) -> (i32, i32) {
    %c0_i32 = arith.constant 0 : i32
    %c0_i32_0 = arith.constant 0 : i32
    return %arg0, %c0_i32 : i32, i32
  }
}

</mosaic_0001>

<bundles_post_ra>
// kernel: tpu_custom_call.1
= control target key start
LH: loop header
LB: loop body
LE: loop exit
PB: predicated region body
PF: predicated region fallthrough
CT: control target
= control target key end

     0   :  { %v355_v3 = vmov 0.0|0.0   ;;  %vm356_vm0 = vmmov 0   ;;  %v357_v6 = vmov 0.0   ;;  %s470_s0 = inlined_call_operand.vmem [shape: f32[8,128], index: 0, kind: input, shape index: {}]   ;;  %s471_s1 = inlined_call_operand.vmem [shape: f32[128,32], index: 1, kind: input, shape index: {}]   ;;  %s472_s2 = inlined_call_operand.vmem [shape: f32[1,32], index: 2, kind: input, shape index: {}]   ;;  %s473_s3 = inlined_call_operand.vmem [shape: f32[32,128], index: 3, kind: input, shape index: {}]   ;;  %s474_s4 = inlined_call_operand.vmem [shape: f32[1,128], index: 4, kind: input, shape index: {}]   ;;  %s475_s5 = inlined_call_operand.hbm [shape: bf16[8,128], index: 5, kind: output, shape index: {}]  }
   0x1   :  { %v27_v0 = vld [vmem:[%s471_s1] sm:$0xff]  ;;  %v28_v1 = vld [vmem:[%s471_s1 + $0x8] sm:$0xff]  ;;  %v29_v2 = vld [vmem:[%s471_s1 + $0x10] sm:$0xff]  ;;  %295 = vmatprep.subr.bf16.mxu0 %v355_v3  ;;  %281 = vmatprep.mubr.msk.f32.mxu0 %vm356_vm0, %v357_v6 }
   0x2   :  { %v296_v4 = vpack.c.bf16 %v28_v1, %v27_v0  ;;  %v30_v5 = vld [vmem:[%s471_s1 + $0x18] sm:$0xff]  ;;  %319 = vmatprep.subr.bf16.mxu1 %v355_v3  ;;  %292 = vmatprep.mubr.msk.f32.mxu1 %vm356_vm0, %v357_v6  ;;  %v31_v8 = vld [vmem:[%s471_s1 + $0x20] sm:$0xff]  ;;  %v32_v9 = vld [vmem:[%s471_s1 + $0x28] sm:$0xff] }
   0x3   :  { %v299_v7 = vpack.c.bf16 %v30_v5, %v29_v2  ;;  %v21_v10 = vld [vmem:[%s470_s0] sm:$0xff] }
   0x4   :  { %297 = vmatpush3.bf16.msra.mxu0 %v296_v4 }
   0x5   :  { %298 = vmatprep.subr.bf16.mxu0 %v355_v3 }
   0x6   :  { %10 = vsyncpa [#allocation3], 0  ;;  %v22_v11 = vmul.f32 %v21_v10, %v21_v10  ;;  %v302_v12 = vpack.c.bf16 %v32_v9, %v31_v8  ;;  %v33_v13 = vld [vmem:[%s471_s1 + $0x30] sm:$0xff]  ;;  %v34_v14 = vld [vmem:[%s471_s1 + $0x38] sm:$0xff]  ;;  %vm134_vm1 = vcmask 261120  }
   0x7   :  { %v305_v15 = vpack.c.bf16 %v34_v14, %v33_v13  ;;  %v35_v16 = vld [vmem:[%s471_s1 + $0x40] sm:$0xff]  ;;  %v36_v17 = vld [vmem:[%s471_s1 + $0x48] sm:$0xff]  ;;  %v37_v19 = vld [vmem:[%s471_s1 + $0x50] sm:$0xff] }
   0x8   :  { %300 = vmatpush3.bf16.msra.mxu0 %v299_v7  ;;  %23 = vadd.xlane.f32.xlu0 %v22_v11  ;;  %v308_v18 = vpack.c.bf16 %v36_v17, %v35_v16  ;;  %v38_v20 = vld [vmem:[%s471_s1 + $0x58] sm:$0xff]  ;;  %v39_v22 = vld [vmem:[%s471_s1 + $0x60] sm:$0xff]  ;;  %v40_v23 = vld [vmem:[%s471_s1 + $0x68] sm:$0xff] }
   0x9   :  { %301 = vmatprep.subr.bf16.mxu0 %v355_v3  ;;  %v311_v21 = vpack.c.bf16 %v38_v20, %v37_v19  ;;  %v314_v24 = vpack.c.bf16 %v40_v23, %v39_v22  ;;  %v41_v25 = vld [vmem:[%s471_s1 + $0x70] sm:$0xff]  ;;  %v42_v26 = vld [vmem:[%s471_s1 + $0x78] sm:$0xff]  ;;  %v123_v28 = vld [vmem:[%s473_s3] sm:$0xff] }
   0xa   :  { %v317_v27 = vpack.c.bf16 %v42_v26, %v41_v25  ;;  %v124_v29 = vld [vmem:[%s473_s3 + $0x8] sm:$0xff]  ;;  %v125_v31 = vld [vmem:[%s473_s3 + $0x10] sm:$0xff]  ;;  %v126_v32 = vld [vmem:[%s473_s3 + $0x18] sm:$0xff]  ;;  %s358_s3 = smov [#allocation2]  }
   0xb   :  { %v320_v30 = vpack.c.bf16 %v124_v29, %v123_v28  ;;  %v323_v33 = vpack.c.bf16 %v126_v32, %v125_v31  ;;  %v224_v38 = vld [vmem:[%s472_s2] ss:$0 sm:$0xff]  ;;  %s216_s12 = sshll.u32 %s358_s3, 4  ;;  %s217_s12 = int_to_ptr.vmem [resolvable:$true] %s216_s12 }
   0xc   :  { %303 = vmatpush3.bf16.msra.mxu0 %v302_v12  ;;  %v225_v43 = vld [vmem:[%s474_s4] ss:$0 sm:$0xff]  ;;  %s331_s0 = scalar_lea.vmem %s217_s12, 64  ;;  %p336_p1 = scmp.lt.s32.totalorder %s217_s12, %s217_s12 }
   0xd   :  { %304 = vmatprep.subr.bf16.mxu0 %v355_v3  ;;  %321 = vmatpush3.bf16.msra.mxu1 %v320_v30  ;;  %p332_p0 = scmp.ne.s32.totalorder %s217_s12, %s331_s0  ;;  %p337_p2 = scmp.lt.s32.totalorder %s331_s0, %s331_s0 }
   0xe   :  { %322 = vmatprep.subr.bf16.mxu1 %v355_v3 }
   0xf   :  { %p338_p3 = por %p337_p2, %p336_p1 }
  0x10   :  { %306 = vmatpush3.bf16.msra.mxu0 %v305_v15 }
  0x11   :  { %307 = vmatprep.subr.bf16.mxu0 %v355_v3  ;;  %324 = vmatpush3.bf16.msra.mxu1 %v323_v33  ;;  %p339_p4 = pnand %p338_p3, %p332_p0 }
  0x14   :  { %309 = vmatpush3.bf16.msra.mxu0 %v308_v18 }
  0x15   :  { %310 = vmatprep.subr.bf16.mxu0 %v355_v3 }
  0x18   :  { %312 = vmatpush3.bf16.msra.mxu0 %v311_v21 }
  0x19   :  { %313 = vmatprep.subr.bf16.mxu0 %v355_v3 }
  0x1c   :  { %315 = vmatpush3.bf16.msra.mxu0 %v314_v24 }
  0x1d   :  { %316 = vmatprep.subr.bf16.mxu0 %v355_v3 }
  0x20   :  { %318 = vmatpush3.bf16.msra.mxu0 %v317_v27 }
  0x23   :  { %282 = vmatmul.mubr.f32.vlgmr.msra.gmra.mrb[0].mxu0 %v21_v10 }
  0x95   :  { %v24_v34 = vpop.xlane.xlu0 %23 }
  0x96   :  { %v25_v35 = vmax.f32 %v24_v34, 1e-24 }
  0x98   :  { %329 = vrsqrt.f32 %v25_v35 }
  0xa2   :  { %v330_v36 = vpop.eup %329 }
  0xf6   :  { %v109_v37 = vpop.f32.mrb[0].mxu0 }
  0xf7   :  { %v113_v39 = vmul.f32 %v330_v36, %v109_v37  ;;  %v283_v40 = vpop.f32.mrb[1].mxu0 }
  0xf9   :  { %v121_v41 = vadd.f32 %v224_v38, %v113_v39 }
  0xfb   :  { %v122_v42 = vmax.f32 %v121_v41, 0.0 }
  0xfd   :  { %293 = vmatmul.mubr.msk.f32.vlgmr.msra.gmra.mrb[0].mxu1 %vm134_vm1, %v122_v42 }
 0x1d0   :  { %v204_v44 = vpop.f32.mrb[0].mxu1 }
 0x1d1   :  { %v205_v45 = vadd.f32 %v225_v43, %v204_v44  ;;  %v294_v46 = vpop.f32.mrb[1].mxu1 }
 0x1d3   :  { %v208_v47 = vpack.c.bf16 %v205_v45, %v205_v45 }
 0x1d5   :  { %209 = vst [vmem:[#allocation2] sm:$0xf] %v208_v47 }
 0x1d6   :  { %342 = shalt.err (!%p339_p4)
}
 0x1d7   :  { %s343_s14 = scalar_lea.hbm %s475_s5, 64 }
 0x1d8   :  { %p344_p5 = scmp.ne.s32.totalorder %s475_s5, %s343_s14  ;;  %p347_p6 = scmp.lt.u32.totalorder %s343_s14, %s475_s5 }
 0x1da   :  { %p349_p7 = pnand %p347_p6, %p344_p5 }
 0x1dc   :  { %352 = shalt.err (!%p349_p7)
}
 0x1dd   :  { %219 = dma.vmem_to_hbm [thread:$0]  %s217_s12, 64, %s475_s5, [#allocation3]  }
 0x1de   :  { %353 = dma.done.wait [#allocation3], 64  }
 0x1df   :  { %354 = vsyncadd [#allocation3], 4294967232 }
 0x1e0   :  { %223 = vsyncpa [#allocation3], 1 }

</bundles_post_ra>
